<compile_context>
chip_gen: v6e
topology: v6e:2x2x1
jax: 0.10.0
libtpu: 0.0.40
codegen_flags: <defaults>
</compile_context>

<pallas_src>
import jax
import jax.numpy as jnp
import numpy as np
from jax.experimental import pallas as pl
from jax.experimental.pallas import tpu as pltpu

N_INPUT = 100            # conv1 input channels (module default n_input)
BN_EPS = 1e-5
DESIRED_TILE_N = 128     # batch elements per grid step (full 128-lane output row)
VMEM_X_BUDGET = 24 << 20  # v7x-safe budget for the double-buffered x block


def _round_up(a, b):
    return ((a + b - 1) // b) * b


def _pick_tile_n(n, c, lp, desired=DESIRED_TILE_N):
    """Batch-tile size: VMEM-safe and keeps >=4 grid steps for v7x megacore."""
    # x block is double-buffered: 2 * c * lp * tile_n * 4 bytes must fit budget.
    vmem_cap = max(8, (VMEM_X_BUDGET // (2 * c * lp * 4)) // 8 * 8)
    # keep n_tiles >= 4 when the batch allows so the "parallel" grid axis feeds
    # both v7x TensorCores (no-op on single-TC v5e / v6e).
    balance_cap = _round_up(pl.cdiv(n, 4), 8)
    return max(8, min(desired, vmem_cap, balance_cap))


def _encoder_head_kernel(x_ref, w1_ref, p_ref, out_ref):
    """Fused conv/BN/ReLU encoder + avg-pool + fc1 + sigmoid for one batch tile.

    x_ref  : (1, C, LP, T) f32 — stride-2 positions on sublanes, batch on lanes.
    w1_ref : (C, LP, T) f32 — conv1 weight row with BN1 scale folded, pre-broadcast
             host-side (constant index_map -> DMA'd once, stays resident).
    p_ref  : SMEM f32[10] folded scalars:
             [shift1, a2, b2, a30, b30, a31, b31, wf0, wf1, bfc]
    out_ref: (1, 1, T) f32 sigmoid outputs (lane-dense row).
    """
    lp = x_ref.shape[2]
    shift1 = p_ref[0]
    a2, b2 = p_ref[1], p_ref[2]
    a30, b30 = p_ref[3], p_ref[4]
    a31, b31 = p_ref[5], p_ref[6]
    wf0, wf1, bf = p_ref[7], p_ref[8], p_ref[9]

    # Conv1d(C->1, k=1, stride=2): exact-f32 VPU multiply + channel reduce
    # (stride-2 positions were pre-selected in the wrapper; BN1 scale is in w1).
    y = jnp.sum(x_ref[0] * w1_ref[...], axis=0)            # (LP, T)
    y = jnp.maximum(y + shift1, 0.0)                        # conv1 bias + BN1 shift, ReLU
    y = jnp.maximum(y * a2 + b2, 0.0)                       # conv2 + BN2 (folded), ReLU
    c0 = jnp.maximum(y * a30 + b30, 0.0)                    # conv3 ch0 + BN3, ReLU
    c1 = jnp.maximum(y * a31 + b31, 0.0)                    # conv3 ch1 + BN3, ReLU
    z = c0 * wf0 + c1 * wf1                                 # fc1 weights folded pre-pool
    logit = jnp.sum(z, axis=0, keepdims=True) * (1.0 / lp) + bf   # avg_pool + fc1 bias
    out_ref[0] = jax.nn.sigmoid(logit)                      # (1, T)


def model_forward(x, w1_col, pvec, desired_tile=DESIRED_TILE_N):
    """x: (N, C, L) float32 (native NCL). Returns sigmoid outputs of shape (N,)."""
    x = x.astype(jnp.float32)
    n, c, l = x.shape

    # conv1 stride-2: only even positions feed the rest of the network; slicing
    # here halves the bytes streamed into the kernel and the conv1 compute.
    xs = x[:, :, ::2]
    lp = xs.shape[-1]

    tile_n = _pick_tile_n(n, c, lp, desired_tile)
    n_pad = _round_up(n, tile_n)
    if n_pad != n:
        xs = jnp.pad(xs, ((0, n_pad - n), (0, 0), (0, 0)))
    n_tiles = n_pad // tile_n

    # Lane packing: batch on the 128-lane axis, positions on sublanes, channels
    # on the major axis (one cheap XLA transpose pass; pure layout plumbing).
    x_t = xs.reshape(n_tiles, tile_n, c, lp).transpose(0, 2, 3, 1)  # (n_tiles, C, LP, T)

    # Hoist the conv1 weight broadcast out of the kernel (JAX does not CSE
    # broadcast_in_dim); constant index_map keeps it VMEM-resident.
    w1b = jnp.broadcast_to(w1_col.astype(jnp.float32).reshape(c, 1, 1), (c, lp, tile_n))

    # TODO(synk): for very long L, add an LP grid axis marked "arbitrary" with a
    # VMEM pooled-sum accumulator instead of shrinking tile_n; _pick_tile_n keeps
    # the double-buffered x block under ~24 MiB (safe for v7x's 64 MiB VMEM); on
    # v5e/v6e raise vmem_limit_bytes if larger blocks are desired.
    out = pl.pallas_call(
        _encoder_head_kernel,
        out_shape=jax.ShapeDtypeStruct((n_tiles, 1, tile_n), jnp.float32),
        grid=(n_tiles,),
        in_specs=[
            pl.BlockSpec((1, c, lp, tile_n), lambda i: (i, 0, 0, 0)),
            pl.BlockSpec((c, lp, tile_n), lambda i: (0, 0, 0)),
            pl.BlockSpec(memory_space=pltpu.MemorySpace.SMEM),
        ],
        out_specs=pl.BlockSpec((1, 1, tile_n), lambda i: (i, 0, 0)),
        compiler_params=pltpu.CompilerParams(dimension_semantics=("parallel",)),
    )(x_t, w1b, pvec)

    # TODO(synk): torch .squeeze() returns a 0-d tensor when N == 1; we return (N,).
    return out.reshape(-1)[:n]


# ------------- deterministic parameter construction + pure-JAX reference -------------

def init_params(key, c_in=N_INPUT):
    ks = jax.random.split(key, 16)
    return {
        "w1": jax.random.normal(ks[0], (1, c_in, 1), jnp.float32) * 0.1,
        "b1": jax.random.normal(ks[1], (1,), jnp.float32) * 0.1,
        "g1": 1.0 + 0.1 * jax.random.normal(ks[2], (1,), jnp.float32),
        "be1": 0.1 * jax.random.normal(ks[3], (1,), jnp.float32),
        "m1": 0.1 * jax.random.normal(ks[4], (1,), jnp.float32),
        "v1": 0.5 + jnp.abs(jax.random.normal(ks[5], (1,), jnp.float32)),
        "w2": jax.random.normal(ks[6], (1, 1, 1), jnp.float32) * 0.5,
        "b2": jax.random.normal(ks[7], (1,), jnp.float32) * 0.1,
        "g2": jnp.ones((1,), jnp.float32),
        "be2": jnp.zeros((1,), jnp.float32),
        "m2": jnp.zeros((1,), jnp.float32),
        "v2": jnp.ones((1,), jnp.float32),
        "w3": jax.random.normal(ks[8], (2, 1, 1), jnp.float32) * 0.5,
        "b3": jax.random.normal(ks[9], (2,), jnp.float32) * 0.1,
        "g3": 1.0 + 0.1 * jax.random.normal(ks[10], (2,), jnp.float32),
        "be3": 0.1 * jax.random.normal(ks[11], (2,), jnp.float32),
        "m3": 0.1 * jax.random.normal(ks[12], (2,), jnp.float32),
        "v3": 0.5 + jnp.abs(jax.random.normal(ks[13], (2,), jnp.float32)),
        "wfc": jax.random.normal(ks[14], (1, 2), jnp.float32) * 0.5,
        "bfc": jax.random.normal(ks[15], (1,), jnp.float32) * 0.1,
    }


def pack_params(r):
    """Fold conv biases + BatchNorms (+ fc1) into per-channel affines (eval-mode BN)."""
    def fold(g, be, m, v):
        s = g / jnp.sqrt(v + BN_EPS)
        return s, be - m * s

    s1, t1 = fold(r["g1"], r["be1"], r["m1"], r["v1"])
    s2, t2 = fold(r["g2"], r["be2"], r["m2"], r["v2"])
    s3, t3 = fold(r["g3"], r["be3"], r["m3"], r["v3"])

    # conv1 weight column with the BN1 scale folded in
    w1_col = (r["w1"][0, :, 0] * s1[0]).astype(jnp.float32)          # (C,)

    shift1 = s1[0] * r["b1"][0] + t1[0]                 # conv1 bias + BN1 shift
    a2 = s2[0] * r["w2"][0, 0, 0]                       # conv2 + BN2 folded
    b2 = s2[0] * r["b2"][0] + t2[0]
    a30 = s3[0] * r["w3"][0, 0, 0]                      # conv3 + BN3 folded
    a31 = s3[1] * r["w3"][1, 0, 0]
    b30 = s3[0] * r["b3"][0] + t3[0]
    b31 = s3[1] * r["b3"][1] + t3[1]

    pvec = jnp.array(
        [shift1, a2, b2, a30, b30, a31, b31,
         r["wfc"][0, 0], r["wfc"][0, 1], r["bfc"][0]], dtype=jnp.float32)
    return w1_col, pvec


def ref_forward(x, r):
    """Pure-JAX reference (exact f32, no MXU) of the torch module in eval-mode BN."""
    def bn(y, g, be, m, v):
        return (y - m[None, :, None]) / jnp.sqrt(v[None, :, None] + BN_EPS) \
            * g[None, :, None] + be[None, :, None]

    xs = x[:, :, ::2]                                                 # stride-2
    # Conv1d(C->1, k=1) as an exact elementwise multiply + channel sum
    y = jnp.sum(xs * r["w1"][0, :, 0][None, :, None], axis=1, keepdims=True) \
        + r["b1"][None, :, None]
    y = jnp.maximum(bn(y, r["g1"], r["be1"], r["m1"], r["v1"]), 0.0)
    y = y * r["w2"][0, 0, 0] + r["b2"][None, :, None]                 # Conv1d(1->1)
    y = jnp.maximum(bn(y, r["g2"], r["be2"], r["m2"], r["v2"]), 0.0)
    y = y * r["w3"][:, 0, 0][None, :, None] + r["b3"][None, :, None]  # Conv1d(1->2)
    y = jnp.maximum(bn(y, r["g3"], r["be3"], r["m3"], r["v3"]), 0.0)
    y = jnp.mean(y, axis=-1)                                          # (N, 2) avg_pool
    logit = y[:, 0] * r["wfc"][0, 0] + y[:, 1] * r["wfc"][0, 1] + r["bfc"][0]
    return jax.nn.sigmoid(logit)                                      # (N,)


if __name__ == "__main__":
    key = jax.random.PRNGKey(0)
    kx1, kx2, kp = jax.random.split(key, 3)

    raw = init_params(kp)
    w1_col, pvec = pack_params(raw)
    fwd = jax.jit(model_forward)

    # Main case: full 128-lane batch tiles, 4 "parallel" grid steps.
    N1, L1 = 512, 16
    x1 = jax.random.normal(kx1, (N1, N_INPUT, L1), jnp.float32)
    out1 = jax.block_until_ready(fwd(x1, w1_col, pvec))
    ref1 = jax.block_until_ready(ref_forward(x1, raw))
    np.testing.assert_allclose(np.asarray(out1), np.asarray(ref1), rtol=1e-5, atol=1e-5)
    assert out1.shape == (N1,)

    # Ragged case: N not a multiple of the tile, odd L (padding + ceil-stride path).
    N2, L2 = 37, 15
    x2 = jax.random.normal(kx2, (N2, N_INPUT, L2), jnp.float32)
    out2 = jax.block_until_ready(fwd(x2, w1_col, pvec))
    ref2 = jax.block_until_ready(ref_forward(x2, raw))
    np.testing.assert_allclose(np.asarray(out2), np.asarray(ref2), rtol=1e-5, atol=1e-5)
    assert out2.shape == (N2,)

    print("KERNEL_OK")
</pallas_src>

<mosaic_0001>
module attributes {stable_mosaic.version = 11 : i64} {
  func.func @_encoder_head_kernel(%arg0: i32, %arg1: memref<1x100x8x128xf32, #tpu.memory_space<vmem>>, %arg2: memref<100x8x128xf32, #tpu.memory_space<vmem>>, %arg3: memref<10xf32, #tpu.memory_space<smem>>, %arg4: memref<1x1x128xf32, #tpu.memory_space<vmem>>) attributes {dimension_semantics = [#tpu.dimension_semantics<parallel>], iteration_bounds = array<i64: 4>, scalar_prefetch = 0 : i64, scratch_operands = 0 : i64, tpu.core_type = #tpu.core_type<tc>, window_params = [{transform_indices = @transform_0, window_bounds = array<i64: 1, 100, 8, 128>}, {pipeline_mode = #tpu.pipeline_mode<synchronous>, transform_indices = @transform_1, window_bounds = array<i64: 100, 8, 128>}, {transform_indices = @transform_2, window_bounds = array<i64: 10>}, {transform_indices = @transform_3, window_bounds = array<i64: 1, 1, 128>}]} {
    %c0 = arith.constant 0 : index
    %0 = memref.load %arg3[%c0] : memref<10xf32, #tpu.memory_space<smem>>
    %c1 = arith.constant 1 : index
    %1 = memref.load %arg3[%c1] : memref<10xf32, #tpu.memory_space<smem>>
    %c2 = arith.constant 2 : index
    %2 = memref.load %arg3[%c2] : memref<10xf32, #tpu.memory_space<smem>>
    %c3 = arith.constant 3 : index
    %3 = memref.load %arg3[%c3] : memref<10xf32, #tpu.memory_space<smem>>
    %c4 = arith.constant 4 : index
    %4 = memref.load %arg3[%c4] : memref<10xf32, #tpu.memory_space<smem>>
    %c5 = arith.constant 5 : index
    %5 = memref.load %arg3[%c5] : memref<10xf32, #tpu.memory_space<smem>>
    %c6 = arith.constant 6 : index
    %6 = memref.load %arg3[%c6] : memref<10xf32, #tpu.memory_space<smem>>
    %c7 = arith.constant 7 : index
    %7 = memref.load %arg3[%c7] : memref<10xf32, #tpu.memory_space<smem>>
    %c8 = arith.constant 8 : index
    %8 = memref.load %arg3[%c8] : memref<10xf32, #tpu.memory_space<smem>>
    %c9 = arith.constant 9 : index
    %9 = memref.load %arg3[%c9] : memref<10xf32, #tpu.memory_space<smem>>
    %c0_0 = arith.constant 0 : index
    %c0_1 = arith.constant 0 : index
    %c0_2 = arith.constant 0 : index
    %c0_3 = arith.constant 0 : index
    %10 = vector.load %arg1[%c0_0, %c0_1, %c0_2, %c0_3] : memref<1x100x8x128xf32, #tpu.memory_space<vmem>>, vector<1x100x8x128xf32>
    %11 = vector.shape_cast %10 : vector<1x100x8x128xf32> to vector<100x8x128xf32>
    %c0_4 = arith.constant 0 : index
    %c0_5 = arith.constant 0 : index
    %c0_6 = arith.constant 0 : index
    %12 = vector.load %arg2[%c0_4, %c0_5, %c0_6] : memref<100x8x128xf32, #tpu.memory_space<vmem>>, vector<100x8x128xf32>
    %13 = arith.mulf %11, %12 : vector<100x8x128xf32>
    %cst = arith.constant dense<0.000000e+00> : vector<8x128xf32>
    %14 = vector.multi_reduction <add>, %13, %cst [0] : vector<100x8x128xf32> to vector<8x128xf32>
    %15 = vector.broadcast %0 : f32 to vector<8x128xf32>
    %16 = arith.addf %14, %15 : vector<8x128xf32>
    %cst_7 = arith.constant 0.000000e+00 : f32
    %17 = vector.broadcast %cst_7 : f32 to vector<8x128xf32>
    %18 = arith.maximumf %16, %17 : vector<8x128xf32>
    %19 = vector.broadcast %1 : f32 to vector<8x128xf32>
    %20 = arith.mulf %18, %19 : vector<8x128xf32>
    %21 = vector.broadcast %2 : f32 to vector<8x128xf32>
    %22 = arith.addf %20, %21 : vector<8x128xf32>
    %cst_8 = arith.constant 0.000000e+00 : f32
    %23 = vector.broadcast %cst_8 : f32 to vector<8x128xf32>
    %24 = arith.maximumf %22, %23 : vector<8x128xf32>
    %25 = vector.broadcast %3 : f32 to vector<8x128xf32>
    %26 = arith.mulf %24, %25 : vector<8x128xf32>
    %27 = vector.broadcast %4 : f32 to vector<8x128xf32>
    %28 = arith.addf %26, %27 : vector<8x128xf32>
    %cst_9 = arith.constant 0.000000e+00 : f32
    %29 = vector.broadcast %cst_9 : f32 to vector<8x128xf32>
    %30 = arith.maximumf %28, %29 : vector<8x128xf32>
    %31 = vector.broadcast %5 : f32 to vector<8x128xf32>
    %32 = arith.mulf %24, %31 : vector<8x128xf32>
    %33 = vector.broadcast %6 : f32 to vector<8x128xf32>
    %34 = arith.addf %32, %33 : vector<8x128xf32>
    %cst_10 = arith.constant 0.000000e+00 : f32
    %35 = vector.broadcast %cst_10 : f32 to vector<8x128xf32>
    %36 = arith.maximumf %34, %35 : vector<8x128xf32>
    %37 = vector.broadcast %7 : f32 to vector<8x128xf32>
    %38 = arith.mulf %30, %37 : vector<8x128xf32>
    %39 = vector.broadcast %8 : f32 to vector<8x128xf32>
    %40 = arith.mulf %36, %39 : vector<8x128xf32>
    %41 = arith.addf %38, %40 : vector<8x128xf32>
    %cst_11 = arith.constant dense<0.000000e+00> : vector<128xf32>
    %42 = vector.multi_reduction <add>, %41, %cst_11 [0] : vector<8x128xf32> to vector<128xf32>
    %43 = vector.shape_cast %42 : vector<128xf32> to vector<1x128xf32>
    %cst_12 = arith.constant 1.250000e-01 : f32
    %44 = vector.broadcast %cst_12 : f32 to vector<1x128xf32>
    %45 = arith.mulf %43, %44 : vector<1x128xf32>
    %46 = vector.broadcast %9 : f32 to vector<1x128xf32>
    %47 = arith.addf %45, %46 : vector<1x128xf32>
    %48 = arith.negf %47 : vector<1x128xf32>
    %49 = math.exp %48 : vector<1x128xf32>
    %cst_13 = arith.constant 1.000000e+00 : f32
    %50 = vector.broadcast %cst_13 : f32 to vector<1x128xf32>
    %51 = arith.addf %50, %49 : vector<1x128xf32>
    %52 = arith.divf %50, %51 : vector<1x128xf32>
    %c0_14 = arith.constant 0 : index
    %c0_15 = arith.constant 0 : index
    %c0_16 = arith.constant 0 : index
    %53 = vector.load %arg4[%c0_14, %c0_15, %c0_16] : memref<1x1x128xf32, #tpu.memory_space<vmem>>, vector<1x1x128xf32>
    %54 = vector.shape_cast %53 : vector<1x1x128xf32> to vector<1x128xf32>
    %55 = vector.shape_cast %52 : vector<1x128xf32> to vector<1x1x128xf32>
    tpu.vector_store %arg4[%c0_14, %c0_15, %c0_16], %55 {strides = array<i32>} : memref<1x1x128xf32, #tpu.memory_space<vmem>>, vector<1x1x128xf32>,
    return
  }
  func.func @transform_0(%arg0: i32) -> (i32, i32, i32, i32) {
    %c0_i32 = arith.constant 0 : i32
    %c0_i32_0 = arith.constant 0 : i32
    %c0_i32_1 = arith.constant 0 : i32
    %c0_i32_2 = arith.constant 0 : i32
    return %arg0, %c0_i32, %c0_i32_0, %c0_i32_1 : i32, i32, i32, i32
  }
  func.func @transform_1(%arg0: i32) -> (i32, i32, i32) {
    %c0_i32 = arith.constant 0 : i32
    %c0_i32_0 = arith.constant 0 : i32
    %c0_i32_1 = arith.constant 0 : i32
    %c0_i32_2 = arith.constant 0 : i32
    return %c0_i32, %c0_i32_0, %c0_i32_1 : i32, i32, i32
  }
  func.func @transform_2(%arg0: i32) -> i32 {
    %c0_i32 = arith.constant 0 : i32
    %c0_i32_0 = arith.constant 0 : i32
    return %c0_i32 : i32
  }
  func.func @transform_3(%arg0: i32) -> (i32, i32, i32) {
    %c0_i32 = arith.constant 0 : i32
    %c0_i32_0 = arith.constant 0 : i32
    %c0_i32_1 = arith.constant 0 : i32
    return %arg0, %c0_i32, %c0_i32_0 : i32, i32, i32
  }
}

</mosaic_0001>

<bundles_post_ra>
// kernel: model_forward.1
= control target key start
LH: loop header
LB: loop body
LE: loop exit
PB: predicated region body
PF: predicated region fallthrough
CT: control target
= control target key end

     0   :  { %8 = vsyncpa [#allocation4], 0  ;;  %s1401_s0 = inlined_call_operand.vmem [shape: f32[4,100,8,128], index: 0, kind: input, shape index: {}]   ;;  %s1402_s1 = inlined_call_operand.vmem [shape: f32[100,8,128], index: 1, kind: input, shape index: {}]   ;;  %s1403_s2 = inlined_call_operand.vmem [shape: f32[10], index: 2, kind: input, shape index: {}]   ;;  %s1404_s3 = inlined_call_operand.hbm [shape: f32[4,1,128], index: 3, kind: output, shape index: {}]  }
   0x1   :  { %9 = vsyncpa [#allocation3], 0 }
   0x2   :  { %11 = vsyncpa [#allocation3 + $0x1], 0  ;;  %s888_s12 = smov 0   ;;  %s890_s13 = smov 0  }
   0x3   :  { %s892_s14 = smov 0   ;;  %s894_s15 = smov 0  }
   0x4 LB: > { %s909_s16 = sadd.s32 4294967295, %s864_s15   ;;  %s710_s17 = sadd.s32 4294967294, %s864_s15   ;;  %s864_s15 = sphi %s894_s15, %s1411_s15   ;;  %s860_s14 = sphi %s892_s14, %s1410_s14   ;;  %s856_s13 = sphi %s890_s13, %s1409_s13   ;;  %s852_s12 = sphi %s888_s12, %s1408_s12  }
   0x5   : > { %s913_s18 = sadd.s32 1, %s864_s15   ;;  %s92_s19 = sadd.s32 1, %s860_s14 }
   0x6   : > { %s89_s20 = ssub.s32 %s864_s15, %s913_s18  ;;  %p102_p0 = scmp.ne.s32.totalorder %s860_s14, %s856_s13 }
   0x7   : > { %p90_p1 = scmp.eq.s32.totalorder %s89_s20, 0  ;;  %p103_p2 = scmp.eq.s32.totalorder %s909_s16, 3 }
   0x8   : > { %p108_p3 = scmp.ne.s32.totalorder %s856_s13, %s852_s12  ;;  %p109_p4 = scmp.eq.s32.totalorder %s710_s17, 3 }
   0x9   : > { %s924_s21 = scalar_select %p90_p1, %s860_s14, %s92_s19  }
   0xa   : > { %p926_p5 = por %p103_p2, %p102_p0  ;;  %p930_p6 = por %p109_p4, %p108_p3 }
   0xb   : > { %p711_p7 = scmp.ge.s32.totalorder %s864_s15, 1  ;;  %p116_p8 = scmp.lt.s32.totalorder %s864_s15, 5 }
   0xc   : > { %p745_p9 = scmp.eq.s32.totalorder %s909_s16, 0  ;;  %s132_s27 = sshll.u32 %s1403_s2, 4  ;;  %s133_s27 = int_to_ptr.vmem [resolvable:$true] %s132_s27 }
   0xd   : > { %p937_p10 = pnand %p711_p7, %p116_p8  ;;  %s785_s28 = scalar_lea.vmem %s133_s27, 16 }
   0xe   : > { %p786_p13 = scmp.ne.s32.totalorder %s133_s27, %s785_s28  ;;  %p793_p3 = scmp.lt.s32.totalorder %s133_s27, %s133_s27 }
   0xf   : > { %p737_p11 = pneg %p937_p10  ;;  %p794_p4 = scmp.lt.s32.totalorder %s785_s28, %s785_s28 }
  0x11   : > { %p738_p12 = pnand %p745_p9, %p737_p11  ;;  %p795_p7 = por %p794_p4, %p793_p3 }
  0x13   : > { %p787_p0 = pneg %p738_p12 }
  0x15   : > { %p788_p1 = pnand %p787_p0, %p786_p13 }
  0x17   : > { %p789_p2 = pneg %p788_p1 }
  0x19   : > { %p796_p8 = pnand %p795_p7, %p789_p2 }
  0x1b   : > { %799 = shalt.err (!%p796_p8)
}
  0x1c   : > { %s866_s29 = smov [#allocation2]   ;;  %153 = sbr.rel (%p937_p10) target bundleno = 325 (0x145), region = 32 }
  0x1d   : > { %740 = dma.vmem_to_smem (!%p738_p12), %s133_s27, 16, %s866_s29, [#allocation4]  }
  0x21   : > { %843 = dma.done.wait (%p745_p9), [#allocation4], 16  }
  0x22   : > { %845 = vsyncadd (%p745_p9), [#allocation4], 4294967280 }
  0x23   : > { %159 = sfence }
  0x24   : > { %p177_p11 = scmp.lt.s32.totalorder %s909_s16, 3  ;;  %v292_v0 = vld [vmem:[%s1402_s1] sm:$0xff]  ;;  %v293_v1 = vld [vmem:[%s1402_s1 + $0x8] sm:$0xff]  ;;  %v294_v2 = vld [vmem:[%s1402_s1 + $0x10] sm:$0xff]  ;;  %s182_s26 = sld [smem:[#allocation2]] }
  0x25   : > { %v295_v3 = vld [vmem:[%s1402_s1 + $0x18] sm:$0xff]  ;;  %v296_v12 = vld [vmem:[%s1402_s1 + $0x20] sm:$0xff]  ;;  %v297_v16 = vld [vmem:[%s1402_s1 + $0x28] sm:$0xff]  ;;  %s718_s5 = sld [smem:[#allocation2 + $0x2]]  ;;  %s175_s17 = sand.u32 1, %s856_s13  }
  0x26   : > { %s178_s30 = scalar_select %p177_p11, %s909_s16, 3  ;;  %v298_v20 = vld [vmem:[%s1402_s1 + $0x30] sm:$0xff]  ;;  %v299_v24 = vld [vmem:[%s1402_s1 + $0x38] sm:$0xff]  ;;  %v300_v28 = vld [vmem:[%s1402_s1 + $0x40] sm:$0xff] }
  0x27   : > { %v301_v32 = vld [vmem:[%s1402_s1 + $0x48] sm:$0xff]  ;;  %v302_v36 = vld [vmem:[%s1402_s1 + $0x50] sm:$0xff]  ;;  %v303_v40 = vld [vmem:[%s1402_s1 + $0x58] sm:$0xff]  ;;  %s719_s6 = sld [smem:[#allocation2 + $0x3]]  ;;  %s727_s20 = sshll.u32 %s909_s16, 4 }
  0x28   : > { %s730_s4 = smul.u32 800, %s178_s30  ;;  %v304_v44 = vld [vmem:[%s1402_s1 + $0x60] sm:$0xff]  ;;  %v305_v48 = vld [vmem:[%s1402_s1 + $0x68] sm:$0xff]  ;;  %v306_v52 = vld [vmem:[%s1402_s1 + $0x70] sm:$0xff]  ;;  %s721_s7 = sld [smem:[#allocation2 + $0x5]] }
  0x29   : > { %v307_v56 = vld [vmem:[%s1402_s1 + $0x78] sm:$0xff]  ;;  %v308_v60 = vld [vmem:[%s1402_s1 + $0x80] sm:$0xff]  ;;  %s720_s8 = sld [smem:[#allocation2 + $0x4]]  ;;  %s176_s24 = scalar_lea.vmem [#allocation5], %s175_s17 }
  0x2a   : > { %s968_s19 = scalar_lea.vmem %s1401_s0, %s730_s4  ;;  %s717_s4 = sld [smem:[#allocation2 + $0x1]] }
  0x2b   : > { %v192_v4 = vld [vmem:[%s968_s19] sm:$0xff]  ;;  %v193_v5 = vld [vmem:[%s968_s19 + $0x8] sm:$0xff]  ;;  %v194_v6 = vld [vmem:[%s968_s19 + $0x10] sm:$0xff]  ;;  %s722_s9 = sld [smem:[#allocation2 + $0x6]]  ;;  %s643_s25 = sshll.u32 %s176_s24, 4  ;;  %s644_s25 = int_to_ptr.vmem [resolvable:$true] %s643_s25 }
  0x2c   : > { %v195_v7 = vld [vmem:[%s968_s19 + $0x18] sm:$0xff]  ;;  %v392_v8 = vmul.f32 %v292_v0, %v192_v4  ;;  %v393_v9 = vmul.f32 %v293_v1, %v193_v5  ;;  %v394_v10 = vmul.f32 %v294_v2, %v194_v6  ;;  %v196_v11 = vld [vmem:[%s968_s19 + $0x20] sm:$0xff]  ;;  %v197_v15 = vld [vmem:[%s968_s19 + $0x28] sm:$0xff]  ;;  %s724_s10 = sld [smem:[#allocation2 + $0x8]]  ;;  %s1366_s28 = scalar_lea.hbm %s1404_s3, %s727_s20 }
  0x2d   : > { %v395_v13 = vmul.f32 %v295_v3, %v195_v7  ;;  %v396_v17 = vmul.f32 %v296_v12, %v196_v11  ;;  %v198_v19 = vld [vmem:[%s968_s19 + $0x30] sm:$0xff]  ;;  %v397_v21 = vmul.f32 %v297_v16, %v197_v15  ;;  %v199_v23 = vld [vmem:[%s968_s19 + $0x38] sm:$0xff]  ;;  %v200_v27 = vld [vmem:[%s968_s19 + $0x40] sm:$0xff]  ;;  %s725_s11 = sld [smem:[#allocation2 + $0x9]]  ;;  %s631_s29 = scalar_lea.sflag [#allocation3], %s175_s17 }
  0x2e   : > { %v492_v14 = vadd.f32 %v393_v9, %v392_v8  ;;  %v398_v25 = vmul.f32 %v298_v20, %v198_v19  ;;  %v399_v29 = vmul.f32 %v299_v24, %v199_v23  ;;  %v201_v31 = vld [vmem:[%s968_s19 + $0x48] sm:$0xff]  ;;  %v400_v33 = vmul.f32 %v300_v28, %v200_v27  ;;  %v202_v35 = vld [vmem:[%s968_s19 + $0x50] sm:$0xff]  ;;  %v203_v39 = vld [vmem:[%s968_s19 + $0x58] sm:$0xff]  ;;  %s800_s30 = scalar_lea.vmem %s644_s25, 16 }
  0x2f   : > { %v401_v37 = vmul.f32 %v301_v32, %v201_v31  ;;  %v402_v41 = vmul.f32 %v302_v36, %v202_v35  ;;  %v204_v43 = vld [vmem:[%s968_s19 + $0x60] sm:$0xff]  ;;  %v403_v45 = vmul.f32 %v303_v40, %v203_v39  ;;  %v205_v47 = vld [vmem:[%s968_s19 + $0x68] sm:$0xff]  ;;  %v206_v51 = vld [vmem:[%s968_s19 + $0x70] sm:$0xff]  ;;  %p801_p9 = scmp.ne.s32.totalorder %s644_s25, %s800_s30 }
  0x30   : > { %v493_v18 = vadd.f32 %v492_v14, %v394_v10  ;;  %v404_v49 = vmul.f32 %v304_v44, %v204_v43  ;;  %v405_v53 = vmul.f32 %v305_v48, %v205_v47  ;;  %v207_v55 = vld [vmem:[%s968_s19 + $0x78] sm:$0xff]  ;;  %v406_v57 = vmul.f32 %v306_v52, %v206_v51  ;;  %v208_v59 = vld [vmem:[%s968_s19 + $0x80] sm:$0xff]  ;;  %v209_v63 = vld [vmem:[%s968_s19 + $0x88] sm:$0xff] }
  0x31   : > { %v407_v61 = vmul.f32 %v307_v56, %v207_v55  ;;  %v309_v0 = vld [vmem:[%s1402_s1 + $0x88] sm:$0xff]  ;;  %v408_v1 = vmul.f32 %v308_v60, %v208_v59  ;;  %v210_v3 = vld [vmem:[%s968_s19 + $0x90] sm:$0xff]  ;;  %v211_v7 = vld [vmem:[%s968_s19 + $0x98] sm:$0xff]  ;;  %p802_p10 = pnand %p801_p9, %p926_p5 }
  0x32   : > { %v494_v22 = vadd.f32 %v493_v18, %v395_v13  ;;  %v310_v4 = vld [vmem:[%s1402_s1 + $0x90] sm:$0xff]  ;;  %v409_v5 = vmul.f32 %v309_v0, %v209_v63  ;;  %v311_v8 = vld [vmem:[%s1402_s1 + $0x98] sm:$0xff]  ;;  %v212_v11 = vld [vmem:[%s968_s19 + $0xa0] sm:$0xff] }
  0x33   : > { %v410_v9 = vmul.f32 %v310_v4, %v210_v3  ;;  %v312_v12 = vld [vmem:[%s1402_s1 + $0xa0] sm:$0xff]  ;;  %v411_v13 = vmul.f32 %v311_v8, %v211_v7  ;;  %v213_v15 = vld [vmem:[%s968_s19 + $0xa8] sm:$0xff]  ;;  %v214_v19 = vld [vmem:[%s968_s19 + $0xb0] sm:$0xff]  ;;  %p803_p12 = pneg %p802_p10 }
  0x34   : > { %v495_v26 = vadd.f32 %v494_v22, %v396_v17  ;;  %v313_v16 = vld [vmem:[%s1402_s1 + $0xa8] sm:$0xff]  ;;  %v412_v17 = vmul.f32 %v312_v12, %v212_v11  ;;  %v314_v20 = vld [vmem:[%s1402_s1 + $0xb0] sm:$0xff]  ;;  %v215_v23 = vld [vmem:[%s968_s19 + $0xb8] sm:$0xff] }
  0x35   : > { %v315_v24 = vld [vmem:[%s1402_s1 + $0xb8] sm:$0xff]  ;;  %v216_v27 = vld [vmem:[%s968_s19 + $0xc0] sm:$0xff]  ;;  %v217_v31 = vld [vmem:[%s968_s19 + $0xc8] sm:$0xff] }
  0x36   : > { %v496_v30 = vadd.f32 %v495_v26, %v397_v21  ;;  %v413_v21 = vmul.f32 %v313_v16, %v213_v15  ;;  %v316_v28 = vld [vmem:[%s1402_s1 + $0xc0] sm:$0xff]  ;;  %v317_v32 = vld [vmem:[%s1402_s1 + $0xc8] sm:$0xff]  ;;  %v218_v35 = vld [vmem:[%s968_s19 + $0xd0] sm:$0xff] }
  0x37   : > { %v318_v36 = vld [vmem:[%s1402_s1 + $0xd0] sm:$0xff]  ;;  %v219_v39 = vld [vmem:[%s968_s19 + $0xd8] sm:$0xff]  ;;  %v220_v43 = vld [vmem:[%s968_s19 + $0xe0] sm:$0xff] }
  0x38   : > { %v497_v34 = vadd.f32 %v496_v30, %v398_v25  ;;  %v414_v25 = vmul.f32 %v314_v20, %v214_v19  ;;  %v319_v40 = vld [vmem:[%s1402_s1 + $0xd8] sm:$0xff]  ;;  %v320_v44 = vld [vmem:[%s1402_s1 + $0xe0] sm:$0xff]  ;;  %v221_v47 = vld [vmem:[%s968_s19 + $0xe8] sm:$0xff] }
  0x39   : > { %v321_v48 = vld [vmem:[%s1402_s1 + $0xe8] sm:$0xff]  ;;  %v222_v51 = vld [vmem:[%s968_s19 + $0xf0] sm:$0xff]  ;;  %v223_v55 = vld [vmem:[%s968_s19 + $0xf8] sm:$0xff] }
  0x3a   : > { %v498_v38 = vadd.f32 %v497_v34, %v399_v29  ;;  %v415_v29 = vmul.f32 %v315_v24, %v215_v23  ;;  %v322_v52 = vld [vmem:[%s1402_s1 + $0xf0] sm:$0xff]  ;;  %v323_v56 = vld [vmem:[%s1402_s1 + $0xf8] sm:$0xff]  ;;  %v224_v59 = vld [vmem:[%s968_s19 + $0x100] sm:$0xff] }
  0x3b   : > { %v324_v60 = vld [vmem:[%s1402_s1 + $0x100] sm:$0xff]  ;;  %v225_v63 = vld [vmem:[%s968_s19 + $0x108] sm:$0xff]  ;;  %v226_v3 = vld [vmem:[%s968_s19 + $0x110] sm:$0xff] }
  0x3c   : > { %v499_v42 = vadd.f32 %v498_v38, %v400_v33  ;;  %v416_v33 = vmul.f32 %v316_v28, %v216_v27  ;;  %v325_v0 = vld [vmem:[%s1402_s1 + $0x108] sm:$0xff]  ;;  %v326_v4 = vld [vmem:[%s1402_s1 + $0x110] sm:$0xff]  ;;  %v227_v7 = vld [vmem:[%s968_s19 + $0x118] sm:$0xff] }
  0x3d   : > { %v327_v8 = vld [vmem:[%s1402_s1 + $0x118] sm:$0xff]  ;;  %v228_v11 = vld [vmem:[%s968_s19 + $0x120] sm:$0xff]  ;;  %v229_v15 = vld [vmem:[%s968_s19 + $0x128] sm:$0xff] }
  0x3e   : > { %v500_v46 = vadd.f32 %v499_v42, %v401_v37  ;;  %v417_v37 = vmul.f32 %v317_v32, %v217_v31  ;;  %v328_v12 = vld [vmem:[%s1402_s1 + $0x120] sm:$0xff]  ;;  %v329_v16 = vld [vmem:[%s1402_s1 + $0x128] sm:$0xff]  ;;  %v230_v19 = vld [vmem:[%s968_s19 + $0x130] sm:$0xff] }
  0x3f   : > { %v330_v20 = vld [vmem:[%s1402_s1 + $0x130] sm:$0xff]  ;;  %v231_v23 = vld [vmem:[%s968_s19 + $0x138] sm:$0xff]  ;;  %v232_v27 = vld [vmem:[%s968_s19 + $0x140] sm:$0xff] }
  0x40   : > { %v501_v50 = vadd.f32 %v500_v46, %v402_v41  ;;  %v418_v41 = vmul.f32 %v318_v36, %v218_v35  ;;  %v331_v24 = vld [vmem:[%s1402_s1 + $0x138] sm:$0xff]  ;;  %v332_v28 = vld [vmem:[%s1402_s1 + $0x140] sm:$0xff]  ;;  %v233_v31 = vld [vmem:[%s968_s19 + $0x148] sm:$0xff] }
  0x41   : > { %v333_v32 = vld [vmem:[%s1402_s1 + $0x148] sm:$0xff]  ;;  %v234_v35 = vld [vmem:[%s968_s19 + $0x150] sm:$0xff] }
  0x42   : > { %v502_v54 = vadd.f32 %v501_v50, %v403_v45  ;;  %v419_v45 = vmul.f32 %v319_v40, %v219_v39  ;;  %v334_v36 = vld [vmem:[%s1402_s1 + $0x150] sm:$0xff]  ;;  %v235_v39 = vld [vmem:[%s968_s19 + $0x158] sm:$0xff] }
  0x43   : > { %v335_v40 = vld [vmem:[%s1402_s1 + $0x158] sm:$0xff] }
  0x44   : > { %v503_v58 = vadd.f32 %v502_v54, %v404_v49  ;;  %v420_v49 = vmul.f32 %v320_v44, %v220_v43  ;;  %v236_v43 = vld [vmem:[%s968_s19 + $0x160] sm:$0xff] }
  0x45   : > { %v336_v44 = vld [vmem:[%s1402_s1 + $0x160] sm:$0xff] }
  0x46   : > { %v504_v62 = vadd.f32 %v503_v58, %v405_v53  ;;  %v421_v53 = vmul.f32 %v321_v48, %v221_v47  ;;  %v237_v47 = vld [vmem:[%s968_s19 + $0x168] sm:$0xff] }
  0x47   : > { %v337_v48 = vld [vmem:[%s1402_s1 + $0x168] sm:$0xff] }
  0x48   : > { %v505_v2 = vadd.f32 %v504_v62, %v406_v57  ;;  %v422_v57 = vmul.f32 %v322_v52, %v222_v51  ;;  %v238_v51 = vld [vmem:[%s968_s19 + $0x170] sm:$0xff] }
  0x49   : > { %v338_v52 = vld [vmem:[%s1402_s1 + $0x170] sm:$0xff] }
  0x4a   : > { %v506_v6 = vadd.f32 %v505_v2, %v407_v61  ;;  %v423_v61 = vmul.f32 %v323_v56, %v223_v55  ;;  %v239_v55 = vld [vmem:[%s968_s19 + $0x178] sm:$0xff] }
  0x4b   : > { %v339_v56 = vld [vmem:[%s1402_s1 + $0x178] sm:$0xff] }
  0x4c   : > { %v507_v10 = vadd.f32 %v506_v6, %v408_v1  ;;  %v424_v1 = vmul.f32 %v324_v60, %v224_v59  ;;  %v240_v59 = vld [vmem:[%s968_s19 + $0x180] sm:$0xff] }
  0x4d   : > { %v340_v60 = vld [vmem:[%s1402_s1 + $0x180] sm:$0xff] }
  0x4e   : > { %v508_v14 = vadd.f32 %v507_v10, %v409_v5  ;;  %v425_v5 = vmul.f32 %v325_v0, %v225_v63  ;;  %v241_v63 = vld [vmem:[%s968_s19 + $0x188] sm:$0xff] }
  0x4f   : > { %v341_v0 = vld [vmem:[%s1402_s1 + $0x188] sm:$0xff] }
  0x50   : > { %v509_v18 = vadd.f32 %v508_v14, %v410_v9  ;;  %v426_v9 = vmul.f32 %v326_v4, %v226_v3  ;;  %v242_v3 = vld [vmem:[%s968_s19 + $0x190] sm:$0xff] }
  0x51   : > { %v342_v4 = vld [vmem:[%s1402_s1 + $0x190] sm:$0xff] }
  0x52   : > { %v510_v22 = vadd.f32 %v509_v18, %v411_v13  ;;  %v427_v13 = vmul.f32 %v327_v8, %v227_v7  ;;  %v243_v7 = vld [vmem:[%s968_s19 + $0x198] sm:$0xff] }
  0x53   : > { %v343_v8 = vld [vmem:[%s1402_s1 + $0x198] sm:$0xff] }
  0x54   : > { %v511_v26 = vadd.f32 %v510_v22, %v412_v17  ;;  %v428_v17 = vmul.f32 %v328_v12, %v228_v11  ;;  %v244_v11 = vld [vmem:[%s968_s19 + $0x1a0] sm:$0xff] }
  0x55   : > { %v344_v12 = vld [vmem:[%s1402_s1 + $0x1a0] sm:$0xff] }
  0x56   : > { %v512_v30 = vadd.f32 %v511_v26, %v413_v21  ;;  %v429_v21 = vmul.f32 %v329_v16, %v229_v15  ;;  %v245_v15 = vld [vmem:[%s968_s19 + $0x1a8] sm:$0xff] }
  0x57   : > { %v345_v16 = vld [vmem:[%s1402_s1 + $0x1a8] sm:$0xff] }
  0x58   : > { %v513_v34 = vadd.f32 %v512_v30, %v414_v25  ;;  %v430_v25 = vmul.f32 %v330_v20, %v230_v19  ;;  %v246_v19 = vld [vmem:[%s968_s19 + $0x1b0] sm:$0xff] }
  0x59   : > { %v346_v20 = vld [vmem:[%s1402_s1 + $0x1b0] sm:$0xff] }
  0x5a   : > { %v514_v38 = vadd.f32 %v513_v34, %v415_v29  ;;  %v431_v29 = vmul.f32 %v331_v24, %v231_v23  ;;  %v247_v23 = vld [vmem:[%s968_s19 + $0x1b8] sm:$0xff] }
  0x5b   : > { %v347_v24 = vld [vmem:[%s1402_s1 + $0x1b8] sm:$0xff] }
  0x5c   : > { %v515_v42 = vadd.f32 %v514_v38, %v416_v33  ;;  %v432_v33 = vmul.f32 %v332_v28, %v232_v27  ;;  %v248_v27 = vld [vmem:[%s968_s19 + $0x1c0] sm:$0xff] }
  0x5d   : > { %v348_v28 = vld [vmem:[%s1402_s1 + $0x1c0] sm:$0xff] }
  0x5e   : > { %v516_v46 = vadd.f32 %v515_v42, %v417_v37  ;;  %v433_v37 = vmul.f32 %v333_v32, %v233_v31  ;;  %v249_v31 = vld [vmem:[%s968_s19 + $0x1c8] sm:$0xff] }
  0x5f   : > { %v349_v32 = vld [vmem:[%s1402_s1 + $0x1c8] sm:$0xff] }
  0x60   : > { %v517_v50 = vadd.f32 %v516_v46, %v418_v41  ;;  %v434_v41 = vmul.f32 %v334_v36, %v234_v35  ;;  %v250_v35 = vld [vmem:[%s968_s19 + $0x1d0] sm:$0xff] }
  0x61   : > { %v350_v36 = vld [vmem:[%s1402_s1 + $0x1d0] sm:$0xff] }
  0x62   : > { %v518_v54 = vadd.f32 %v517_v50, %v419_v45  ;;  %v435_v45 = vmul.f32 %v335_v40, %v235_v39  ;;  %v251_v39 = vld [vmem:[%s968_s19 + $0x1d8] sm:$0xff] }
  0x63   : > { %v351_v40 = vld [vmem:[%s1402_s1 + $0x1d8] sm:$0xff] }
  0x64   : > { %v519_v58 = vadd.f32 %v518_v54, %v420_v49  ;;  %v436_v49 = vmul.f32 %v336_v44, %v236_v43  ;;  %v252_v43 = vld [vmem:[%s968_s19 + $0x1e0] sm:$0xff] }
  0x65   : > { %v352_v44 = vld [vmem:[%s1402_s1 + $0x1e0] sm:$0xff] }
  0x66   : > { %v520_v62 = vadd.f32 %v519_v58, %v421_v53  ;;  %v437_v53 = vmul.f32 %v337_v48, %v237_v47  ;;  %v253_v47 = vld [vmem:[%s968_s19 + $0x1e8] sm:$0xff] }
  0x67   : > { %v353_v48 = vld [vmem:[%s1402_s1 + $0x1e8] sm:$0xff] }
  0x68   : > { %v521_v2 = vadd.f32 %v520_v62, %v422_v57  ;;  %v438_v57 = vmul.f32 %v338_v52, %v238_v51  ;;  %v254_v51 = vld [vmem:[%s968_s19 + $0x1f0] sm:$0xff] }
  0x69   : > { %v354_v52 = vld [vmem:[%s1402_s1 + $0x1f0] sm:$0xff] }
  0x6a   : > { %v522_v6 = vadd.f32 %v521_v2, %v423_v61  ;;  %v439_v61 = vmul.f32 %v339_v56, %v239_v55  ;;  %v255_v55 = vld [vmem:[%s968_s19 + $0x1f8] sm:$0xff] }
  0x6b   : > { %v355_v56 = vld [vmem:[%s1402_s1 + $0x1f8] sm:$0xff] }
  0x6c   : > { %v523_v10 = vadd.f32 %v522_v6, %v424_v1  ;;  %v440_v1 = vmul.f32 %v340_v60, %v240_v59  ;;  %v256_v59 = vld [vmem:[%s968_s19 + $0x200] sm:$0xff] }
  0x6d   : > { %v356_v60 = vld [vmem:[%s1402_s1 + $0x200] sm:$0xff] }
  0x6e   : > { %v524_v14 = vadd.f32 %v523_v10, %v425_v5  ;;  %v441_v5 = vmul.f32 %v341_v0, %v241_v63  ;;  %v257_v63 = vld [vmem:[%s968_s19 + $0x208] sm:$0xff] }
  0x6f   : > { %v357_v0 = vld [vmem:[%s1402_s1 + $0x208] sm:$0xff] }
  0x70   : > { %v525_v18 = vadd.f32 %v524_v14, %v426_v9  ;;  %v442_v9 = vmul.f32 %v342_v4, %v242_v3  ;;  %v258_v3 = vld [vmem:[%s968_s19 + $0x210] sm:$0xff] }
  0x71   : > { %v358_v4 = vld [vmem:[%s1402_s1 + $0x210] sm:$0xff] }
  0x72   : > { %v526_v22 = vadd.f32 %v525_v18, %v427_v13  ;;  %v443_v13 = vmul.f32 %v343_v8, %v243_v7  ;;  %v259_v7 = vld [vmem:[%s968_s19 + $0x218] sm:$0xff] }
  0x73   : > { %v359_v8 = vld [vmem:[%s1402_s1 + $0x218] sm:$0xff] }
  0x74   : > { %v527_v26 = vadd.f32 %v526_v22, %v428_v17  ;;  %v444_v17 = vmul.f32 %v344_v12, %v244_v11  ;;  %v260_v11 = vld [vmem:[%s968_s19 + $0x220] sm:$0xff] }
  0x75   : > { %v360_v12 = vld [vmem:[%s1402_s1 + $0x220] sm:$0xff] }
  0x76   : > { %v528_v30 = vadd.f32 %v527_v26, %v429_v21  ;;  %v445_v21 = vmul.f32 %v345_v16, %v245_v15  ;;  %v261_v15 = vld [vmem:[%s968_s19 + $0x228] sm:$0xff] }
  0x77   : > { %v361_v16 = vld [vmem:[%s1402_s1 + $0x228] sm:$0xff] }
  0x78   : > { %v529_v34 = vadd.f32 %v528_v30, %v430_v25  ;;  %v446_v25 = vmul.f32 %v346_v20, %v246_v19  ;;  %v262_v19 = vld [vmem:[%s968_s19 + $0x230] sm:$0xff] }
  0x79   : > { %v362_v20 = vld [vmem:[%s1402_s1 + $0x230] sm:$0xff] }
  0x7a   : > { %v530_v38 = vadd.f32 %v529_v34, %v431_v29  ;;  %v447_v29 = vmul.f32 %v347_v24, %v247_v23  ;;  %v263_v23 = vld [vmem:[%s968_s19 + $0x238] sm:$0xff] }
  0x7b   : > { %v363_v24 = vld [vmem:[%s1402_s1 + $0x238] sm:$0xff] }
  0x7c   : > { %v531_v42 = vadd.f32 %v530_v38, %v432_v33  ;;  %v448_v33 = vmul.f32 %v348_v28, %v248_v27  ;;  %v264_v27 = vld [vmem:[%s968_s19 + $0x240] sm:$0xff] }
  0x7d   : > { %v364_v28 = vld [vmem:[%s1402_s1 + $0x240] sm:$0xff] }
  0x7e   : > { %v532_v46 = vadd.f32 %v531_v42, %v433_v37  ;;  %v449_v37 = vmul.f32 %v349_v32, %v249_v31  ;;  %v265_v31 = vld [vmem:[%s968_s19 + $0x248] sm:$0xff] }
  0x7f   : > { %v365_v32 = vld [vmem:[%s1402_s1 + $0x248] sm:$0xff] }
  0x80   : > { %v533_v50 = vadd.f32 %v532_v46, %v434_v41  ;;  %v450_v41 = vmul.f32 %v350_v36, %v250_v35  ;;  %v266_v35 = vld [vmem:[%s968_s19 + $0x250] sm:$0xff] }
  0x81   : > { %v366_v36 = vld [vmem:[%s1402_s1 + $0x250] sm:$0xff] }
  0x82   : > { %v534_v54 = vadd.f32 %v533_v50, %v435_v45  ;;  %v451_v45 = vmul.f32 %v351_v40, %v251_v39  ;;  %v267_v39 = vld [vmem:[%s968_s19 + $0x258] sm:$0xff] }
  0x83   : > { %v367_v40 = vld [vmem:[%s1402_s1 + $0x258] sm:$0xff] }
  0x84   : > { %v535_v58 = vadd.f32 %v534_v54, %v436_v49  ;;  %v452_v49 = vmul.f32 %v352_v44, %v252_v43  ;;  %v268_v43 = vld [vmem:[%s968_s19 + $0x260] sm:$0xff] }
  0x85   : > { %v368_v44 = vld [vmem:[%s1402_s1 + $0x260] sm:$0xff] }
  0x86   : > { %v536_v62 = vadd.f32 %v535_v58, %v437_v53  ;;  %v453_v53 = vmul.f32 %v353_v48, %v253_v47  ;;  %v269_v47 = vld [vmem:[%s968_s19 + $0x268] sm:$0xff] }
  0x87   : > { %v369_v48 = vld [vmem:[%s1402_s1 + $0x268] sm:$0xff] }
  0x88   : > { %v537_v2 = vadd.f32 %v536_v62, %v438_v57  ;;  %v454_v57 = vmul.f32 %v354_v52, %v254_v51  ;;  %v270_v51 = vld [vmem:[%s968_s19 + $0x270] sm:$0xff] }
  0x89   : > { %v370_v52 = vld [vmem:[%s1402_s1 + $0x270] sm:$0xff] }
  0x8a   : > { %v538_v6 = vadd.f32 %v537_v2, %v439_v61  ;;  %v455_v61 = vmul.f32 %v355_v56, %v255_v55  ;;  %v271_v55 = vld [vmem:[%s968_s19 + $0x278] sm:$0xff] }
  0x8b   : > { %v371_v56 = vld [vmem:[%s1402_s1 + $0x278] sm:$0xff] }
  0x8c   : > { %v539_v10 = vadd.f32 %v538_v6, %v440_v1  ;;  %v456_v1 = vmul.f32 %v356_v60, %v256_v59  ;;  %v272_v59 = vld [vmem:[%s968_s19 + $0x280] sm:$0xff] }
  0x8d   : > { %v372_v60 = vld [vmem:[%s1402_s1 + $0x280] sm:$0xff] }
  0x8e   : > { %v540_v14 = vadd.f32 %v539_v10, %v441_v5  ;;  %v457_v5 = vmul.f32 %v357_v0, %v257_v63  ;;  %v273_v63 = vld [vmem:[%s968_s19 + $0x288] sm:$0xff] }
  0x8f   : > { %v373_v0 = vld [vmem:[%s1402_s1 + $0x288] sm:$0xff] }
  0x90   : > { %v541_v18 = vadd.f32 %v540_v14, %v442_v9  ;;  %v458_v9 = vmul.f32 %v358_v4, %v258_v3  ;;  %v274_v3 = vld [vmem:[%s968_s19 + $0x290] sm:$0xff] }
  0x91   : > { %v374_v4 = vld [vmem:[%s1402_s1 + $0x290] sm:$0xff] }
  0x92   : > { %v542_v22 = vadd.f32 %v541_v18, %v443_v13  ;;  %v459_v13 = vmul.f32 %v359_v8, %v259_v7  ;;  %v275_v7 = vld [vmem:[%s968_s19 + $0x298] sm:$0xff] }
  0x93   : > { %v375_v8 = vld [vmem:[%s1402_s1 + $0x298] sm:$0xff] }
  0x94   : > { %v543_v26 = vadd.f32 %v542_v22, %v444_v17  ;;  %v460_v17 = vmul.f32 %v360_v12, %v260_v11  ;;  %v276_v11 = vld [vmem:[%s968_s19 + $0x2a0] sm:$0xff] }
  0x95   : > { %v376_v12 = vld [vmem:[%s1402_s1 + $0x2a0] sm:$0xff] }
  0x96   : > { %v544_v30 = vadd.f32 %v543_v26, %v445_v21  ;;  %v461_v21 = vmul.f32 %v361_v16, %v261_v15  ;;  %v277_v15 = vld [vmem:[%s968_s19 + $0x2a8] sm:$0xff] }
  0x97   : > { %v377_v16 = vld [vmem:[%s1402_s1 + $0x2a8] sm:$0xff] }
  0x98   : > { %v545_v34 = vadd.f32 %v544_v30, %v446_v25  ;;  %v462_v25 = vmul.f32 %v362_v20, %v262_v19  ;;  %v278_v19 = vld [vmem:[%s968_s19 + $0x2b0] sm:$0xff] }
  0x99   : > { %v378_v20 = vld [vmem:[%s1402_s1 + $0x2b0] sm:$0xff] }
  0x9a   : > { %v546_v38 = vadd.f32 %v545_v34, %v447_v29  ;;  %v463_v29 = vmul.f32 %v363_v24, %v263_v23  ;;  %v279_v23 = vld [vmem:[%s968_s19 + $0x2b8] sm:$0xff] }
  0x9b   : > { %v379_v24 = vld [vmem:[%s1402_s1 + $0x2b8] sm:$0xff] }
  0x9c   : > { %v547_v42 = vadd.f32 %v546_v38, %v448_v33  ;;  %v464_v33 = vmul.f32 %v364_v28, %v264_v27  ;;  %v280_v27 = vld [vmem:[%s968_s19 + $0x2c0] sm:$0xff] }
  0x9d   : > { %v380_v28 = vld [vmem:[%s1402_s1 + $0x2c0] sm:$0xff] }
  0x9e   : > { %v548_v46 = vadd.f32 %v547_v42, %v449_v37  ;;  %v465_v37 = vmul.f32 %v365_v32, %v265_v31  ;;  %v281_v31 = vld [vmem:[%s968_s19 + $0x2c8] sm:$0xff] }
  0x9f   : > { %v381_v32 = vld [vmem:[%s1402_s1 + $0x2c8] sm:$0xff] }
  0xa0   : > { %v549_v50 = vadd.f32 %v548_v46, %v450_v41  ;;  %v466_v41 = vmul.f32 %v366_v36, %v266_v35  ;;  %v282_v35 = vld [vmem:[%s968_s19 + $0x2d0] sm:$0xff] }
  0xa1   : > { %v382_v36 = vld [vmem:[%s1402_s1 + $0x2d0] sm:$0xff] }
  0xa2   : > { %v550_v54 = vadd.f32 %v549_v50, %v451_v45  ;;  %v467_v45 = vmul.f32 %v367_v40, %v267_v39  ;;  %v283_v39 = vld [vmem:[%s968_s19 + $0x2d8] sm:$0xff] }
  0xa3   : > { %v383_v40 = vld [vmem:[%s1402_s1 + $0x2d8] sm:$0xff] }
  0xa4   : > { %v551_v58 = vadd.f32 %v550_v54, %v452_v49  ;;  %v468_v49 = vmul.f32 %v368_v44, %v268_v43  ;;  %v284_v43 = vld [vmem:[%s968_s19 + $0x2e0] sm:$0xff] }
  0xa5   : > { %v384_v44 = vld [vmem:[%s1402_s1 + $0x2e0] sm:$0xff] }
  0xa6   : > { %v552_v62 = vadd.f32 %v551_v58, %v453_v53  ;;  %v469_v53 = vmul.f32 %v369_v48, %v269_v47  ;;  %v285_v47 = vld [vmem:[%s968_s19 + $0x2e8] sm:$0xff] }
  0xa7   : > { %v385_v48 = vld [vmem:[%s1402_s1 + $0x2e8] sm:$0xff] }
  0xa8   : > { %v553_v2 = vadd.f32 %v552_v62, %v454_v57  ;;  %v470_v57 = vmul.f32 %v370_v52, %v270_v51  ;;  %v286_v51 = vld [vmem:[%s968_s19 + $0x2f0] sm:$0xff] }
  0xa9   : > { %v386_v52 = vld [vmem:[%s1402_s1 + $0x2f0] sm:$0xff] }
  0xaa   : > { %v554_v6 = vadd.f32 %v553_v2, %v455_v61  ;;  %v471_v61 = vmul.f32 %v371_v56, %v271_v55  ;;  %v287_v55 = vld [vmem:[%s968_s19 + $0x2f8] sm:$0xff] }
  0xab   : > { %v387_v56 = vld [vmem:[%s1402_s1 + $0x2f8] sm:$0xff] }
  0xac   : > { %v555_v10 = vadd.f32 %v554_v6, %v456_v1  ;;  %v472_v1 = vmul.f32 %v372_v60, %v272_v59  ;;  %v288_v59 = vld [vmem:[%s968_s19 + $0x300] sm:$0xff] }
  0xad   : > { %v388_v60 = vld [vmem:[%s1402_s1 + $0x300] sm:$0xff] }
  0xae   : > { %v556_v14 = vadd.f32 %v555_v10, %v457_v5  ;;  %v473_v5 = vmul.f32 %v373_v0, %v273_v63  ;;  %v289_v63 = vld [vmem:[%s968_s19 + $0x308] sm:$0xff] }
  0xaf   : > { %v389_v0 = vld [vmem:[%s1402_s1 + $0x308] sm:$0xff] }
  0xb0   : > { %v557_v18 = vadd.f32 %v556_v14, %v458_v9  ;;  %v474_v9 = vmul.f32 %v374_v4, %v274_v3  ;;  %v290_v3 = vld [vmem:[%s968_s19 + $0x310] sm:$0xff] }
  0xb1   : > { %v390_v4 = vld [vmem:[%s1402_s1 + $0x310] sm:$0xff] }
  0xb2   : > { %v558_v22 = vadd.f32 %v557_v18, %v459_v13  ;;  %v475_v13 = vmul.f32 %v375_v8, %v275_v7  ;;  %v291_v7 = vld [vmem:[%s968_s19 + $0x318] sm:$0xff]  ;;  %s723_s19 = sld [smem:[#allocation2 + $0x7]] }
  0xb3   : > { %v391_v8 = vld [vmem:[%s1402_s1 + $0x318] sm:$0xff] }
  0xb4   : > { %v559_v26 = vadd.f32 %v558_v22, %v460_v17  ;;  %v476_v17 = vmul.f32 %v376_v12, %v276_v11  ;;  %v491_v11 = vmul.f32 %v391_v8, %v291_v7 }
  0xb6   : > { %v560_v30 = vadd.f32 %v559_v26, %v461_v21  ;;  %v477_v21 = vmul.f32 %v377_v16, %v277_v15 }
  0xb8   : > { %v561_v34 = vadd.f32 %v560_v30, %v462_v25  ;;  %v478_v25 = vmul.f32 %v378_v20, %v278_v19  ;;  %v596_v19 = vstv %s718_s5 }
  0xba   : > { %v562_v38 = vadd.f32 %v561_v34, %v463_v29  ;;  %v479_v29 = vmul.f32 %v379_v24, %v279_v23  ;;  %v604_v23 = vstv %s721_s7 }
  0xbc   : > { %v563_v42 = vadd.f32 %v562_v38, %v464_v33  ;;  %v480_v33 = vmul.f32 %v380_v28, %v280_v27 }
  0xbe   : > { %v564_v46 = vadd.f32 %v563_v42, %v465_v37  ;;  %v481_v37 = vmul.f32 %v381_v32, %v281_v31  ;;  %v609_v31 = vstv %s723_s19  ;;  %v611_v32 = vstv %s724_s10 }
  0xc0   : > { %v565_v50 = vadd.f32 %v564_v46, %v466_v41  ;;  %v482_v41 = vmul.f32 %v382_v36, %v282_v35 }
  0xc2   : > { %v566_v54 = vadd.f32 %v565_v50, %v467_v45  ;;  %v483_v45 = vmul.f32 %v383_v40, %v283_v39 }
  0xc4   : > { %v567_v58 = vadd.f32 %v566_v54, %v468_v49  ;;  %v484_v49 = vmul.f32 %v384_v44, %v284_v43  ;;  %v621_v44 = vstv %s725_s11 }
  0xc6   : > { %v568_v62 = vadd.f32 %v567_v58, %v469_v53  ;;  %v485_v53 = vmul.f32 %v385_v48, %v285_v47 }
  0xc8   : > { %v569_v2 = vadd.f32 %v568_v62, %v470_v57  ;;  %v486_v57 = vmul.f32 %v386_v52, %v286_v51 }
  0xca   : > { %v570_v6 = vadd.f32 %v569_v2, %v471_v61  ;;  %v487_v61 = vmul.f32 %v387_v56, %v287_v55 }
  0xcc   : > { %v571_v10 = vadd.f32 %v570_v6, %v472_v1  ;;  %v488_v1 = vmul.f32 %v388_v60, %v288_v59 }
  0xce   : > { %v572_v14 = vadd.f32 %v571_v10, %v473_v5  ;;  %v489_v5 = vmul.f32 %v389_v0, %v289_v63 }
  0xd0   : > { %v573_v18 = vadd.f32 %v572_v14, %v474_v9  ;;  %v490_v9 = vmul.f32 %v390_v4, %v290_v3  ;;  %v591_v14 = vstv %s182_s26 }
  0xd2   : > { %v574_v22 = vadd.f32 %v573_v18, %v475_v13 }
  0xd4   : > { %v575_v26 = vadd.f32 %v574_v22, %v476_v17  ;;  %v594_v17 = vstv %s717_s4  ;;  %v599_v22 = vstv %s719_s6  ;;  %s867_s4 = smov [#allocation5]  }
  0xd5   : > { %s804_s5 = sshll.u32 %s867_s4, 4  ;;  %s805_s5 = int_to_ptr.vmem [resolvable:$false] %s804_s5 }
  0xd6   : > { %v576_v30 = vadd.f32 %v575_v26, %v477_v21  ;;  %v606_v26 = vstv %s722_s9  ;;  %s806_s16 = scalar_lea.vmem %s805_s5, 32  ;;  %p807_p13 = scmp.lt.s32.totalorder %s644_s25, %s805_s5 }
  0xd7   : > { %p808_p0 = scmp.lt.s32.totalorder %s806_s16, %s800_s30 }
  0xd8   : > { %v577_v34 = vadd.f32 %v576_v30, %v478_v25  ;;  %v601_v25 = vstv %s720_s8 }
  0xd9   : > { %p809_p1 = por %p808_p0, %p807_p13 }
  0xda   : > { %v578_v38 = vadd.f32 %v577_v34, %v479_v29 }
  0xdb   : > { %p810_p2 = pnand %p809_p1, %p803_p12 }
  0xdc   : > { %v579_v42 = vadd.f32 %v578_v38, %v480_v33 }
  0xde   : > { %v580_v46 = vadd.f32 %v579_v42, %v481_v37 }
  0xe0   : > { %v581_v50 = vadd.f32 %v580_v46, %v482_v41 }
  0xe2   : > { %v582_v54 = vadd.f32 %v581_v50, %v483_v45 }
  0xe4   : > { %v583_v58 = vadd.f32 %v582_v54, %v484_v49 }
  0xe6   : > { %v584_v62 = vadd.f32 %v583_v58, %v485_v53 }
  0xe8   : > { %v585_v2 = vadd.f32 %v584_v62, %v486_v57 }
  0xea   : > { %v586_v6 = vadd.f32 %v585_v2, %v487_v61 }
  0xec   : > { %v587_v10 = vadd.f32 %v586_v6, %v488_v1 }
  0xee   : > { %v588_v12 = vadd.f32 %v587_v10, %v489_v5 }
  0xf0   : > { %v589_v13 = vadd.f32 %v588_v12, %v490_v9 }
  0xf2   : > { %v590_v15 = vadd.f32 %v589_v13, %v491_v11 }
  0xf4   : > { %v592_v16 = vadd.f32 %v591_v14, %v590_v15 }
  0xf6   : > { %v593_v18 = vmax.f32 %v592_v16, 0.0 }
  0xf8   : > { %v595_v20 = vmul.f32 %v594_v17, %v593_v18 }
  0xfa   : > { %v597_v21 = vadd.f32 %v596_v19, %v595_v20 }
  0xfc   : > { %v598_v24 = vmax.f32 %v597_v21, 0.0 }
  0xfe   : > { %v600_v27 = vmul.f32 %v599_v22, %v598_v24  ;;  %v605_v28 = vmul.f32 %v604_v23, %v598_v24 }
 0x100   : > { %v602_v29 = vadd.f32 %v601_v25, %v600_v27  ;;  %v607_v30 = vadd.f32 %v606_v26, %v605_v28 }
 0x102   : > { %v603_v33 = vmax.f32 %v602_v29, 0.0  ;;  %v608_v34 = vmax.f32 %v607_v30, 0.0 }
 0x104   : > { %v610_v35 = vmul.f32 %v609_v31, %v603_v33  ;;  %v612_v36 = vmul.f32 %v611_v32, %v608_v34 }
 0x106   : > { %v613_v37 = vadd.f32 %v612_v36, %v610_v35 }
 0x108   : > { %v614_v38 = vrot.slane %v613_v37, 4 }
 0x10a   : > { %v615_v39 = vadd.f32 %v614_v38, %v613_v37 }
 0x10c   : > { %v616_v40 = vrot.slane %v615_v39, 2 }
 0x10e   : > { %v617_v41 = vadd.f32 %v616_v40, %v615_v39 }
 0x110   : > { %v618_v42 = vrot.slane %v617_v41, 1 }
 0x112   : > { %v619_v43 = vadd.f32 %v618_v42, %v617_v41 }
 0x114   : > { %v620_v45 = vmul.f32 0.125, %v619_v43 }
 0x116   : > { %v622_v46 = vadd.f32 %v621_v44, %v620_v45 }
 0x118   : > { %v726_v47 = vmul.f32 -1.442695, %v622_v46 }
 0x11a   : > { %781 = vpow2.f32 %v726_v47 }
 0x127   : > { %v782_v48 = vpop.eup %781 }
 0x128   : > { %v626_v49 = vadd.f32 1.0, %v782_v48 }
 0x12a   : > { %783 = vrcp.f32 %v626_v49 }
 0x137   : > { %v784_v50 = vpop.eup %783 }
 0x138   : > { %629 = vst [vmem:[%s176_s24] sm:$0x1] %v784_v50 }
 0x139   : > { %813 = shalt.err (!%p810_p2)
}
 0x13a   : > { %s814_s6 = scalar_lea.hbm %s1366_s28, 16  ;;  %s818_s9 = scalar_lea.hbm %s1404_s3, 64 }
 0x13b   : > { %p815_p3 = scmp.ne.s32.totalorder %s1366_s28, %s814_s6  ;;  %p819_p8 = scmp.lt.s32.totalorder %s1366_s28, %s1404_s3 }
 0x13c   : > { %p820_p11 = scmp.lt.s32.totalorder %s818_s9, %s814_s6 }
 0x13d   : > { %p816_p4 = pnand %p815_p3, %p926_p5 }
 0x13e   : > { %p821_p9 = por %p820_p11, %p819_p8 }
 0x13f   : > { %p817_p7 = pneg %p816_p4 }
 0x141   : > { %p822_p10 = pnand %p821_p9, %p817_p7 }
 0x143   : > { %825 = shalt.err (!%p822_p10)
}
 0x144   : > { %735 = dma.vmem_to_hbm [thread:$0]  (%p926_p5), %s644_s25, 16, %s1366_s28, %s631_s29  }
 0x145 PF: > { %p747_p12 = scmp.ge.s32.totalorder %s864_s15, 2  ;;  %s655_s11 = sand.u32 1, %s852_s12  }
 0x146   : > { %s656_s17 = scalar_lea.sflag [#allocation3], %s655_s11 }
 0x147   : > { %p742_p13 = pnand %p747_p12, %p930_p6 }
 0x149   : > { %p743_p0 = pneg %p742_p13 }
 0x14b   : > { %847 = dma.done.wait (%p743_p0), %s656_s17, 16  }
 0x14c   : > { %849 = vsyncadd (%p743_p0), %s656_s17, 4294967280  ;;  %p14_p1 = scmp.ge.s32.totalorder %s913_s18, 6   ;;  %s1408_s12 = smov %s856_s13 }
 0x14d   : > { %s1409_s13 = smov %s860_s14  ;;  %s1410_s14 = smov %s924_s21 }
 0x14e   : > { %s1411_s15 = smov %s913_s18  ;;  %16 = sbr.rel (!%p14_p1) target bundleno = 4 (0x4), region = 72 }
 0x153   :  { %660 = vsyncpa [#allocation3], 1 }
 0x154   :  { %662 = vsyncpa [#allocation3 + $0x1], 1 }
 0x155   :  { %663 = vsyncpa [#allocation4], 1 }
 0x156   :  { %665 = vsyncpa [#allocation4 + $0x1], 1 }

</bundles_post_ra>
